<compile_context>
chip_gen: v7x
topology: tpu7x:2x2x1
jax: 0.10.0
libtpu: 0.0.40
codegen_flags: <defaults>
</compile_context>

<pallas_src>
import functools

import jax
import jax.numpy as jnp
from jax.experimental import pallas as pl
from jax.experimental.pallas import tpu as pltpu


def _head_kernel(x_ref, w_ref, b_ref, cls_ref, bbox_ref, *, score_out):
    # x_ref: (Cin, thw), w_ref: (Cout, Cin), b_ref: (Cout, 1)
    # cls_ref: (score_out, thw), bbox_ref: (Cout - score_out, thw)
    acc = jnp.dot(w_ref[...], x_ref[...], preferred_element_type=jnp.float32)
    acc = acc + b_ref[...]  # broadcast bias along the lane (spatial) dim
    cls_ref[...] = acc[:score_out, :].astype(cls_ref.dtype)
    bbox_ref[...] = acc[score_out:, :].astype(bbox_ref.dtype)


def conv1x1_head_pallas(x, w, b, score_out, *, thw=512):
    """1x1 conv + channel split in native NCHW layout.

    x: (N, Cin, H, W)   w: (Cout, Cin)   b: (Cout,)
    Returns (cls_score (N, score_out, H, W), bbox (N, Cout-score_out, H, W)).
    """
    N, Cin, H, W = x.shape
    Cout = w.shape[0]
    bbox_out = Cout - score_out
    HW = H * W

    x_flat = x.reshape(N, Cin, HW)          # contiguous view, no transpose
    b2 = b.reshape(Cout, 1)

    # Lane (spatial) tile: multiple of 128, no larger than the padded extent.
    thw = max(128, min(thw, ((HW + 127) // 128) * 128))
    grid = (N, pl.cdiv(HW, thw))

    kernel = functools.partial(_head_kernel, score_out=score_out)
    cls_flat, bbox_flat = pl.pallas_call(
        kernel,
        out_shape=(
            jax.ShapeDtypeStruct((N, score_out, HW), x.dtype),
            jax.ShapeDtypeStruct((N, bbox_out, HW), x.dtype),
        ),
        grid_spec=pltpu.PrefetchScalarGridSpec(
            num_scalar_prefetch=0,
            grid=grid,
            in_specs=[
                # Batch dim squeezed; kernel sees (Cin, thw).
                pl.BlockSpec((None, Cin, thw), lambda n, j: (n, 0, j)),
                # Whole weight / bias, constant index_map -> VMEM-resident.
                pl.BlockSpec((Cout, Cin), lambda n, j: (0, 0)),
                pl.BlockSpec((Cout, 1), lambda n, j: (0, 0)),
            ],
            out_specs=(
                pl.BlockSpec((None, score_out, thw), lambda n, j: (n, 0, j)),
                pl.BlockSpec((None, bbox_out, thw), lambda n, j: (n, 0, j)),
            ),
        ),
        compiler_params=pltpu.CompilerParams(
            dimension_semantics=("parallel", "parallel"),
        ),
    )(x_flat, w, b2)

    return (cls_flat.reshape(N, score_out, H, W),
            bbox_flat.reshape(N, bbox_out, H, W))


class HeaderPallas:
    """JAX/Pallas equivalent of the PyTorch `Header` module."""

    def __init__(self, num_classes, key):
        self.anchor_orients = [0.0, jnp.pi / 2]
        n_orients = len(self.anchor_orients)
        self.score_out = (num_classes + 1) * n_orients
        self.bbox_out = 8 * n_orients
        cin = 256
        cout = self.score_out + self.bbox_out
        kw, kb = jax.random.split(key)
        # Deterministic synthetic init (Conv2d default-ish uniform scale).
        bound = 1.0 / jnp.sqrt(cin * 1.0)
        # PyTorch conv weight is (Cout, Cin, 1, 1); we keep (Cout, Cin) — the
        # natural layout for the (Cout, Cin) @ (Cin, HW) kernel (lane dim 256).
        self.w = jax.random.uniform(kw, (cout, cin), jnp.float32, -bound, bound)
        self.b = jax.random.uniform(kb, (cout,), jnp.float32, -bound, bound)

    def __call__(self, x):
        # x: (N, C=256, H, W) -- NCHW, same as PyTorch. Output stays NCHW.
        cls_score, bbox = conv1x1_head_pallas(x, self.w, self.b, self.score_out)
        return cls_score, bbox


if __name__ == "__main__":
    key = jax.random.PRNGKey(0)
    k_param, k_x = jax.random.split(key)

    num_classes = 3  # score_out = (3+1)*2 = 8, bbox_out = 16
    header = HeaderPallas(num_classes, k_param)

    # Small input consistent with the module: Cin must be 256.
    N, C, H, W = 2, 256, 16, 16
    x = jax.random.normal(k_x, (N, C, H, W), jnp.float32)

    cls_score, bbox = header(x)
    jax.block_until_ready((cls_score, bbox))

    # Sanity checks vs a plain-JAX reference of the same 1x1 conv.
    ref = (
        jnp.einsum("nchw,oc->nohw", x, header.w)
        + header.b.reshape(1, -1, 1, 1)
    )
    ref_cls, ref_bbox = ref[:, : header.score_out], ref[:, header.score_out:]
    assert cls_score.shape == (N, header.score_out, H, W)
    assert bbox.shape == (N, header.bbox_out, H, W)
    assert jnp.allclose(cls_score, ref_cls, atol=1e-4, rtol=1e-4)
    assert jnp.allclose(bbox, ref_bbox, atol=1e-4, rtol=1e-4)

    print("KERNEL_OK")
</pallas_src>

<mosaic_0001>
module attributes {stable_mosaic.version = 11 : i64} {
  func.func @_head_kernel(%arg0: i32, %arg1: i32, %arg2: memref<1x256x256xf32, #tpu.memory_space<vmem>>, %arg3: memref<24x256xf32, #tpu.memory_space<vmem>>, %arg4: memref<24x1xf32, #tpu.memory_space<vmem>>, %arg5: memref<1x8x256xf32, #tpu.memory_space<vmem>>, %arg6: memref<1x16x256xf32, #tpu.memory_space<vmem>>) attributes {dimension_semantics = [#tpu.dimension_semantics<parallel>, #tpu.dimension_semantics<parallel>], iteration_bounds = array<i64: 2, 1>, scalar_prefetch = 0 : i64, scratch_operands = 0 : i64, tpu.core_type = #tpu.core_type<tc>, window_params = [{transform_indices = @transform_0, window_bounds = array<i64: 1, 256, 256>}, {pipeline_mode = #tpu.pipeline_mode<synchronous>, transform_indices = @transform_1, window_bounds = array<i64: 24, 256>}, {pipeline_mode = #tpu.pipeline_mode<synchronous>, transform_indices = @transform_2, window_bounds = array<i64: 24, 1>}, {transform_indices = @transform_3, window_bounds = array<i64: 1, 8, 256>}, {transform_indices = @transform_4, window_bounds = array<i64: 1, 16, 256>}]} {
    %c0 = arith.constant 0 : index
    %c0_0 = arith.constant 0 : index
    %0 = vector.load %arg3[%c0, %c0_0] : memref<24x256xf32, #tpu.memory_space<vmem>>, vector<24x256xf32>
    %c0_1 = arith.constant 0 : index
    %c0_2 = arith.constant 0 : index
    %c0_3 = arith.constant 0 : index
    %1 = vector.load %arg2[%c0_1, %c0_2, %c0_3] : memref<1x256x256xf32, #tpu.memory_space<vmem>>, vector<1x256x256xf32>
    %2 = vector.shape_cast %1 : vector<1x256x256xf32> to vector<256x256xf32>
    %cst = arith.constant dense<0.000000e+00> : vector<24x256xf32>
    %3 = tpu.matmul %0, %2, %cst {dimension_numbers = #tpu.dot_dimension_numbers<[1], [0], [0], [1], [0, 0, 1, 1], [], []>} : vector<24x256xf32>, vector<256x256xf32>, vector<24x256xf32> -> vector<24x256xf32>
    %c0_4 = arith.constant 0 : index
    %c0_5 = arith.constant 0 : index
    %4 = vector.load %arg4[%c0_4, %c0_5] : memref<24x1xf32, #tpu.memory_space<vmem>>, vector<24x1xf32>
    %5 = vector.broadcast %4 : vector<24x1xf32> to vector<24x256xf32>
    %6 = arith.addf %3, %5 : vector<24x256xf32>
    %7 = vector.extract_strided_slice %6 {offsets = [0, 0], sizes = [8, 256], strides = [1, 1]} : vector<24x256xf32> to vector<8x256xf32>
    %c0_6 = arith.constant 0 : index
    %c0_7 = arith.constant 0 : index
    %c0_8 = arith.constant 0 : index
    %8 = vector.load %arg5[%c0_6, %c0_7, %c0_8] : memref<1x8x256xf32, #tpu.memory_space<vmem>>, vector<1x8x256xf32>
    %9 = vector.shape_cast %8 : vector<1x8x256xf32> to vector<8x256xf32>
    %10 = vector.shape_cast %7 : vector<8x256xf32> to vector<1x8x256xf32>
    tpu.vector_store %arg5[%c0_6, %c0_7, %c0_8], %10 {strides = array<i32>} : memref<1x8x256xf32, #tpu.memory_space<vmem>>, vector<1x8x256xf32>,
    %11 = vector.extract_strided_slice %6 {offsets = [8, 0], sizes = [16, 256], strides = [1, 1]} : vector<24x256xf32> to vector<16x256xf32>
    %c0_9 = arith.constant 0 : index
    %c0_10 = arith.constant 0 : index
    %c0_11 = arith.constant 0 : index
    %12 = vector.load %arg6[%c0_9, %c0_10, %c0_11] : memref<1x16x256xf32, #tpu.memory_space<vmem>>, vector<1x16x256xf32>
    %13 = vector.shape_cast %12 : vector<1x16x256xf32> to vector<16x256xf32>
    %14 = vector.shape_cast %11 : vector<16x256xf32> to vector<1x16x256xf32>
    tpu.vector_store %arg6[%c0_9, %c0_10, %c0_11], %14 {strides = array<i32>} : memref<1x16x256xf32, #tpu.memory_space<vmem>>, vector<1x16x256xf32>,
    return
  }
  func.func @transform_0(%arg0: i32, %arg1: i32) -> (i32, i32, i32) {
    %c0_i32 = arith.constant 0 : i32
    %c0_i32_0 = arith.constant 0 : i32
    return %arg0, %c0_i32, %arg1 : i32, i32, i32
  }
  func.func @transform_1(%arg0: i32, %arg1: i32) -> (i32, i32) {
    %c0_i32 = arith.constant 0 : i32
    %c0_i32_0 = arith.constant 0 : i32
    %c0_i32_1 = arith.constant 0 : i32
    return %c0_i32, %c0_i32_0 : i32, i32
  }
  func.func @transform_2(%arg0: i32, %arg1: i32) -> (i32, i32) {
    %c0_i32 = arith.constant 0 : i32
    %c0_i32_0 = arith.constant 0 : i32
    %c0_i32_1 = arith.constant 0 : i32
    return %c0_i32, %c0_i32_0 : i32, i32
  }
  func.func @transform_3(%arg0: i32, %arg1: i32) -> (i32, i32, i32) {
    %c0_i32 = arith.constant 0 : i32
    %c0_i32_0 = arith.constant 0 : i32
    return %arg0, %c0_i32, %arg1 : i32, i32, i32
  }
  func.func @transform_4(%arg0: i32, %arg1: i32) -> (i32, i32, i32) {
    %c0_i32 = arith.constant 0 : i32
    %c0_i32_0 = arith.constant 0 : i32
    return %arg0, %c0_i32, %arg1 : i32, i32, i32
  }
}

</mosaic_0001>

<bundles_post_ra>
// kernel: tpu_custom_call.1
= control target key start
LH: loop header
LB: loop body
LE: loop exit
PB: predicated region body
PF: predicated region fallthrough
CT: control target
= control target key end

     0   :  { %10 = vsyncpa [#allocation3], 0  ;;  %s1369_s0 = inlined_call_operand.hbm [shape: f32[2,256,256], index: 0, kind: input, shape index: {}]   ;;  %s1370_s1 = inlined_call_operand.hbm [shape: f32[24,256], index: 1, kind: input, shape index: {}]   ;;  %s1371_s2 = inlined_call_operand.vmem [shape: f32[24,1], index: 2, kind: input, shape index: {}]   ;;  %s1372_s3 = inlined_call_operand.hbm [shape: f32[2,8,256], index: 3, kind: output, shape index: {0}]   ;;  %s1373_s4 = inlined_call_operand.hbm [shape: f32[2,16,256], index: 4, kind: output, shape index: {1}]  }
   0x1   :  { %12 = vsyncpa [#allocation3 + $0x1], 0 }
   0x2   :  { %13 = vsyncpa [#allocation6], 0 }
   0x3   :  { %14 = vsyncpa [#allocation4], 0 }
   0x4   :  { %16 = vsyncpa [#allocation4 + $0x1], 0 }
   0x5   :  { %17 = vsyncpa [#allocation9], 0 }
   0x6   :  { %19 = vsyncpa [#allocation9 + $0x1], 0  ;;  %s1028_s15 = smov 0   ;;  %s1030_s16 = smov 0  }
   0x7   :  { %s1032_s17 = smov 0   ;;  %s1034_s18 = smov 0  }
   0x8   :  { %s1036_s19 = smov 0   ;;  %s1038_s20 = smov 0  }
   0x9 LB: > { %s611_s21 = sadd.s32 4294967295, %s992_s20   ;;  %s612_s22 = sadd.s32 4294967294, %s992_s20   ;;  %s992_s20 = sphi %s1038_s20, %s25_s20   ;;  %s988_s19 = sphi %s1036_s19, %s1397_s19   ;;  %s984_s18 = sphi %s1034_s18, %s1396_s18   ;;  %s980_s17 = sphi %s1032_s17, %s1395_s17   ;;  %s976_s16 = sphi %s1030_s16, %s1394_s16   ;;  %s972_s15 = sphi %s1028_s15, %s1393_s15  }
   0xa   : > { %p59_p0 = scmp.ne.s32.totalorder %s976_s16, %s972_s15  ;;  %p1062_p1 = scmp.eq.s32.totalorder %s611_s21, 0 }
   0xb   : > { %p1066_p2 = scmp.eq.s32.totalorder %s611_s21, 1  ;;  %p133_p3 = scmp.eq.s32.totalorder %s612_s22, 1 }
   0xc   : > { %s1378_s23 = scalar_select %p1062_p1, 1, 0 }
   0xd   : > { %s1379_s24 = scalar_select %p1066_p2, 1, 0 }
   0xe   : > { %p1072_p4 = por %p1062_p1, %p59_p0  ;;  %p613_p5 = scmp.ge.s32.totalorder %s992_s20, 1 }
   0xf   : > { %p1077_p6 = por %p133_p3, %p59_p0  ;;  %p168_p7 = scmp.lt.s32.totalorder %s992_s20, 3 }
  0x10   : > { %s1380_s25 = scalar_select %p1072_p4, 1, 0 }
  0x11   : > { %s1381_s26 = scalar_select %p1077_p6, 1, 0 }
  0x12   : > { %p1082_p8 = pnand %p613_p5, %p168_p7  ;;  %s994_s28 = smov [#allocation5]  }
  0x13   : > { %s180_s29 = sshll.u32 %s994_s28, 4  ;;  %s37_s5 = sadd.s32 1, %s988_s19  ;;  %s181_s29 = int_to_ptr.vmem [resolvable:$true] %s180_s29 }
  0x14   : > { %s1382_s27 = scalar_select %p1082_p8, 1, 0 }
  0x15   : > { %p741_p9 = pneg %p1082_p8  ;;  %s816_s8 = scalar_lea.hbm %s1370_s1, 768 }
  0x16   : > { %p817_p12 = scmp.ne.s32.totalorder %s1370_s1, %s816_s8  ;;  %p823_p5 = scmp.lt.u32.totalorder %s816_s8, %s1370_s1 }
  0x17   : > { %p1091_p11 = pnand %p741_p9, %p1062_p1 }
  0x19   : > { %p818_p13 = pneg %p1091_p11 }
  0x1b   : > { %p819_p0 = pnand %p818_p13, %p817_p12 }
  0x1d   : > { %p820_p3 = pneg %p819_p0 }
  0x1f   : > { %p825_p7 = pnand %p823_p5, %p820_p3 }
  0x21   : > { %828 = shalt.err (!%p825_p7)
}
  0x22   : > { %s829_s13 = scalar_lea.vmem %s181_s29, 768  ;;  %p837_p1 = scmp.lt.s32.totalorder %s181_s29, %s181_s29 }
  0x23   : > { %p830_p9 = scmp.ne.s32.totalorder %s181_s29, %s829_s13  ;;  %p838_p4 = scmp.lt.s32.totalorder %s829_s13, %s829_s13 }
  0x25   : > { %p832_p10 = pnand %p830_p9, %p818_p13  ;;  %p839_p8 = por %p838_p4, %p837_p1 }
  0x27   : > { %p833_p6 = pneg %p832_p10 }
  0x29   : > { %p840_p2 = pnand %p839_p8, %p833_p6 }
  0x2b   : > { %843 = shalt.err (!%p840_p2)
}
  0x2c   : > { %s995_s14 = smov 256   ;;  %s996_s21 = smov 16  }
  0x2d   : > { %744 = dma.hbm_to_vmem [thread:$0]  (!%p1091_p11), %s1370_s1, 768, %s181_s29, [#allocation6], %s995_s14, %s995_s14, %s996_s21  }
  0x2e   : > { %p39_p1 = scmp.ge.s32.totalorder %s37_s5, 2  ;;  %s46_s6 = sadd.s32 1, %s980_s17 }
  0x2f   : > { %p53_p2 = scmp.ne.s32.totalorder %s980_s17, %s976_s16  ;;  %p54_p4 = scmp.eq.s32.totalorder %s992_s20, 0 }
  0x30   : > { %s1399_s5 = smov (%p39_p1, %s37_s5), 0  ;;  %p1385_p8 = scmp.ne.s32.totalorder %s1379_s24, 0 }
  0x31   : > { %p1121_p6 = por %p54_p4, %p53_p2  ;;  %s41_s8 = ssub.s32 %s988_s19, %s1399_s5 }
  0x32   : > { %p1127_p10 = por %p1385_p8, %p53_p2  ;;  %p757_p12 = scmp.lt.s32.totalorder %s992_s20, 2 }
  0x33   : > { %p44_p11 = scmp.eq.s32.totalorder %s41_s8, 0  ;;  %s197_s29 = sand.u32 1, %s980_s17  }
  0x34   : > { %s616_s9 = sshll.u32 %s197_s29, 9  ;;  %s632_s11 = sshll.u32 %s988_s19, 13 }
  0x35   : > { %s1136_s10 = scalar_select %p44_p11, %s980_s17, %s46_s6  }
  0x36   : > { %s1142_s22 = scalar_lea.hbm %s1369_s0, %s632_s11  ;;  %s201_s24 = scalar_lea.vmem [#allocation2], %s616_s9 }
  0x37   : > { %s210_s28 = sshll.u32 %s201_s24, 4  ;;  %p1148_p13 = pnand %p757_p12, %p1121_p6  ;;  %s1144_s28 = int_to_ptr.vmem [resolvable:$true] %s210_s28 }
  0x38   : > { %s1152_s6 = scalar_lea.sflag [#allocation3], %s197_s29  ;;  %s844_s12 = scalar_lea.hbm %s1142_s22, 8192 }
  0x39   : > { %p845_p0 = scmp.ne.s32.totalorder %s1142_s22, %s844_s12  ;;  %p846_p3 = pneg %p1148_p13 }
  0x3a   : > { %s849_s7 = scalar_lea.hbm %s1369_s0, 16384  ;;  %p850_p9 = scmp.lt.u32.totalorder %s1142_s22, %s1369_s0 }
  0x3b   : > { %p847_p5 = pnand %p846_p3, %p845_p0  ;;  %p851_p1 = scmp.lt.u32.totalorder %s849_s7, %s844_s12 }
  0x3c   : > { %p853_p4 = scmp.lt.u32.totalorder %s844_s12, %s1142_s22 }
  0x3d   : > { %p848_p7 = pneg %p847_p5  ;;  %p852_p2 = por %p851_p1, %p850_p9 }
  0x3f   : > { %p854_p6 = por %p853_p4, %p852_p2 }
  0x41   : > { %p855_p8 = pnand %p854_p6, %p848_p7 }
  0x43   : > { %858 = shalt.err (!%p855_p8)
}
  0x44   : > { %s859_s29 = scalar_lea.vmem %s1144_s28, 8192  ;;  %s997_s9 = smov [#allocation2]  }
  0x45   : > { %p860_p12 = scmp.ne.s32.totalorder %s1144_s28, %s859_s29  ;;  %s864_s11 = sshll.u32 %s997_s9, 4  ;;  %s865_s11 = int_to_ptr.vmem [resolvable:$false] %s864_s11 }
  0x46   : > { %s866_s13 = scalar_lea.vmem %s865_s11, 16384  ;;  %p867_p5 = scmp.lt.s32.totalorder %s1144_s28, %s865_s11 }
  0x47   : > { %p862_p11 = pnand %p860_p12, %p846_p3  ;;  %p868_p9 = scmp.lt.s32.totalorder %s866_s13, %s859_s29 }
  0x49   : > { %p863_p0 = pneg %p862_p11  ;;  %p869_p1 = por %p868_p9, %p867_p5 }
  0x4b   : > { %p870_p2 = pnand %p869_p1, %p863_p0 }
  0x4d   : > { %873 = shalt.err (!%p870_p2)
}
  0x4e   : > { %748 = dma.hbm_to_vmem [thread:$0]  (!%p1148_p13), %s1142_s22, 8192, %s1144_s28, %s1152_s6, %s995_s14, %s995_s14, %s996_s21  }
  0x4f   : > { %p1388_p3 = scmp.ne.s32.totalorder %s1382_s27, 0 }
  0x50   : > { %s1186_s12 = sand.u32 (!%p1388_p3), 1, %s976_s16   ;;  %p1389_p7 = scmp.ne.s32.totalorder (!%p1388_p3), %s1380_s25, 0 }
  0x51   : > { %222 = sbr.rel (%p1388_p3) target bundleno = 413 (0x19d), region = 32  ;;  %s620_s7 = sshll.u32 (!%p1388_p3), %s1186_s12, 9 }
  0x52   : > { %s225_s24 = scalar_lea.sflag (!%p1388_p3), [#allocation3], %s1186_s12  ;;  %s1190_s29 = scalar_lea.vmem (!%p1388_p3), [#allocation2], %s620_s7 }
  0x58   : > { %955 = dma.done.wait (%p1389_p7), %s225_s24, 8192  }
  0x59   : > { %957 = vsyncadd (%p1389_p7), %s225_s24, 4294959104  ;;  %p1390_p13 = scmp.ne.s32.totalorder %s1378_s23, 0 }
  0x5b   : > { %959 = dma.done.wait (%p1390_p13), [#allocation6], 768  }
  0x5c   : > { %961 = vsyncadd (%p1390_p13), [#allocation6], 4294966528  ;;  %v998_v0 = vmov 0   ;;  %v272_v1 = vld [vmem:[%s1190_s29 + $0x8] sm:$0xff]  ;;  %v274_v2 = vld [vmem:[%s1190_s29 + $0x18] sm:$0xff]  ;;  %s622_s28 = sshll.u32 %s1186_s12, 4 }
  0x5d   : > { %814 = vset.pattern.permute.xlu0 %v998_v0  ;;  %815 = vset.pattern.permute.xlu1 %v998_v0  ;;  %v271_v3 = vld [vmem:[%s1190_s29] sm:$0xff]  ;;  %v635_v4 = vpack.c.bf16 %v274_v2, %v272_v1  ;;  %v273_v5 = vld [vmem:[%s1190_s29 + $0x10] sm:$0xff]  ;;  %v276_v6 = vld [vmem:[%s1190_s29 + $0x28] sm:$0xff]  ;;  %s623_s8 = sshll.u32 %s1186_s12, 5  ;;  %s633_s6 = sshll.u32 %s984_s18, 8 }
  0x5e   : > { %v278_v7 = vld [vmem:[%s1190_s29 + $0x38] sm:$0xff]  ;;  %v637_v8 = vpack.c.bf16 %v273_v5, %v271_v3  ;;  %v275_v10 = vld [vmem:[%s1190_s29 + $0x20] sm:$0xff]  ;;  %v277_v11 = vld [vmem:[%s1190_s29 + $0x30] sm:$0xff]  ;;  %s254_s9 = scalar_lea.vmem [#allocation7], %s622_s28  ;;  %s1276_s13 = scalar_lea.vmem [#allocation8], %s623_s8 }
  0x5f   : > { %v639_v9 = vpack.c.bf16 %v278_v7, %v276_v6  ;;  %v280_v12 = vld [vmem:[%s1190_s29 + $0x48] sm:$0xff]  ;;  %636 = vmatprep.subr.bf16.mxu0 %v635_v4  ;;  %699 = vmatprep.subr.bf16.mxu1 %v635_v4  ;;  %v282_v13 = vld [vmem:[%s1190_s29 + $0x58] sm:$0xff]  ;;  %v641_v14 = vpack.c.bf16 %v277_v11, %v275_v10  ;;  %v279_v16 = vld [vmem:[%s1190_s29 + $0x40] sm:$0xff]  ;;  %s464_s11 = sshll.u32 %s254_s9, 4  ;;  %s479_s7 = sshll.u32 %s1276_s13, 4  ;;  %s1284_s11 = int_to_ptr.vmem [resolvable:$true] %s464_s11  ;;  %s1287_s7 = int_to_ptr.vmem [resolvable:$true] %s479_s7 }
  0x60   : > { %638 = vmatpush1.bf16.msra.mxu0 %v637_v8  ;;  %715 = vmatpush1.bf16.msra.mxu1 %v637_v8  ;;  %v643_v15 = vpack.c.bf16 %v282_v13, %v280_v12  ;;  %v281_v17 = vld [vmem:[%s1190_s29 + $0x50] sm:$0xff]  ;;  %v284_v18 = vld [vmem:[%s1190_s29 + $0x68] sm:$0xff]  ;;  %v286_v19 = vld [vmem:[%s1190_s29 + $0x78] sm:$0xff]  ;;  %s1282_s23 = scalar_lea.hbm %s1372_s3, %s633_s6  ;;  %s634_s25 = sshll.u32 %s984_s18, 9 }
  0x61   : > { %640 = vmatprep.subr.bf16.mxu0 %v639_v9  ;;  %700 = vmatprep.subr.bf16.mxu1 %v639_v9  ;;  %v645_v20 = vpack.c.bf16 %v281_v17, %v279_v16  ;;  %v647_v21 = vpack.c.bf16 %v286_v19, %v284_v18  ;;  %v283_v22 = vld [vmem:[%s1190_s29 + $0x60] sm:$0xff]  ;;  %v285_v23 = vld [vmem:[%s1190_s29 + $0x70] sm:$0xff]  ;;  %v288_v24 = vld [vmem:[%s1190_s29 + $0x88] sm:$0xff]  ;;  %s443_s27 = scalar_lea.sflag [#allocation4], %s1186_s12  ;;  %s874_s14 = scalar_lea.vmem %s1284_s11, 256 }
  0x62   : > { %v290_v25 = vld [vmem:[%s1190_s29 + $0x98] sm:$0xff]  ;;  %v649_v26 = vpack.c.bf16 %v285_v23, %v283_v22  ;;  %v287_v28 = vld [vmem:[%s1190_s29 + $0x80] sm:$0xff]  ;;  %v289_v29 = vld [vmem:[%s1190_s29 + $0x90] sm:$0xff]  ;;  %p875_p4 = scmp.ne.s32.totalorder %s1284_s11, %s874_s14  ;;  %s999_s21 = smov [#allocation7]  }
  0x63   : > { %v651_v27 = vpack.c.bf16 %v290_v25, %v288_v24  ;;  %v292_v30 = vld [vmem:[%s1190_s29 + $0xa8] sm:$0xff]  ;;  %v294_v31 = vld [vmem:[%s1190_s29 + $0xb8] sm:$0xff]  ;;  %v653_v32 = vpack.c.bf16 %v289_v29, %v287_v28  ;;  %v291_v34 = vld [vmem:[%s1190_s29 + $0xa0] sm:$0xff]  ;;  %s878_s22 = sshll.u32 %s999_s21, 4  ;;  %s879_s22 = int_to_ptr.vmem [resolvable:$false] %s878_s22 }
  0x64   : > { %642 = vmatpush1.bf16.msra.mxu0 %v641_v14  ;;  %716 = vmatpush1.bf16.msra.mxu1 %v641_v14  ;;  %v655_v33 = vpack.c.bf16 %v294_v31, %v292_v30  ;;  %v293_v35 = vld [vmem:[%s1190_s29 + $0xb0] sm:$0xff]  ;;  %v296_v36 = vld [vmem:[%s1190_s29 + $0xc8] sm:$0xff]  ;;  %v298_v37 = vld [vmem:[%s1190_s29 + $0xd8] sm:$0xff]  ;;  %p876_p6 = pnand %p875_p4, %p1127_p10  ;;  %s880_s28 = scalar_lea.vmem %s879_s22, 512 }
  0x65   : > { %644 = vmatprep.subr.bf16.mxu0 %v643_v15  ;;  %701 = vmatprep.subr.bf16.mxu1 %v643_v15  ;;  %v657_v38 = vpack.c.bf16 %v293_v35, %v291_v34  ;;  %v295_v39 = vld [vmem:[%s1190_s29 + $0xc0] sm:$0xff]  ;;  %v659_v40 = vpack.c.bf16 %v298_v37, %v296_v36  ;;  %v297_v41 = vld [vmem:[%s1190_s29 + $0xd0] sm:$0xff]  ;;  %v266_v42 = vld [vmem:[#allocation5 + $0x8] sm:$0xff]  ;;  %p881_p12 = scmp.lt.s32.totalorder %s1284_s11, %s879_s22  ;;  %p882_p11 = scmp.lt.s32.totalorder %s880_s28, %s874_s14 }
  0x66   : > { %v268_v43 = vld [vmem:[#allocation5 + $0x18] sm:$0xff]  ;;  %v300_v44 = vld [vmem:[%s1190_s29 + $0xe8] sm:$0xff]  ;;  %417 = vmatprep.mubr.f32.mxu0 %v266_v42  ;;  %v335_v46 = vld [vmem:[%s1371_s2] sm:$0xff]  ;;  %v661_v47 = vpack.c.bf16 %v297_v41, %v295_v39  ;;  %p877_p8 = pneg %p876_p6 }
  0x67   : > { %v302_v45 = vld [vmem:[%s1190_s29 + $0xf8] sm:$0xff]  ;;  %423 = vmatprep.mubr.f32.mxu1 %v268_v43  ;;  %v337_v48 = vld [vmem:[%s1371_s2 + $0x10] sm:$0xff]  ;;  %v299_v50 = vld [vmem:[%s1190_s29 + $0xe0] sm:$0xff]  ;;  %340 = vperm.xlu0 %814, %v335_v46   ;;  %p883_p0 = por %p882_p11, %p881_p12 }
  0x68   : > { %646 = vmatpush1.bf16.msra.mxu0 %v645_v20  ;;  %717 = vmatpush1.bf16.msra.mxu1 %v645_v20  ;;  %v663_v49 = vpack.c.bf16 %v302_v45, %v300_v44  ;;  %v301_v51 = vld [vmem:[%s1190_s29 + $0xf0] sm:$0xff]  ;;  %v304_v52 = vld [vmem:[%s1190_s29 + $0x108] sm:$0xff]  ;;  %v306_v53 = vld [vmem:[%s1190_s29 + $0x118] sm:$0xff] }
  0x69   : > { %648 = vmatprep.subr.bf16.mxu0 %v647_v21  ;;  %702 = vmatprep.subr.bf16.mxu1 %v647_v21  ;;  %v336_v54 = vld [vmem:[%s1371_s2 + $0x8] sm:$0xff]  ;;  %v665_v55 = vpack.c.bf16 %v301_v51, %v299_v50  ;;  %v667_v56 = vpack.c.bf16 %v306_v53, %v304_v52  ;;  %v303_v57 = vld [vmem:[%s1190_s29 + $0x100] sm:$0xff]  ;;  %v305_v58 = vld [vmem:[%s1190_s29 + $0x110] sm:$0xff]  ;;  %p884_p5 = pnand %p883_p0, %p877_p8 }
  0x6a   : > { %350 = vperm.xlu1 %815, %v337_v48   ;;  %v308_v59 = vld [vmem:[%s1190_s29 + $0x128] sm:$0xff]  ;;  %v310_v60 = vld [vmem:[%s1190_s29 + $0x138] sm:$0xff]  ;;  %v669_v61 = vpack.c.bf16 %v305_v58, %v303_v57  ;;  %v307_v63 = vld [vmem:[%s1190_s29 + $0x120] sm:$0xff] }
  0x6b   : > { %345 = vperm.xlu0 %814, %v336_v54   ;;  %v671_v62 = vpack.c.bf16 %v310_v60, %v308_v59  ;;  %v309_v0 = vld [vmem:[%s1190_s29 + $0x130] sm:$0xff]  ;;  %v312_v1 = vld [vmem:[%s1190_s29 + $0x148] sm:$0xff]  ;;  %v314_v2 = vld [vmem:[%s1190_s29 + $0x158] sm:$0xff] }
  0x6c   : > { %650 = vmatpush1.bf16.msra.mxu0 %v649_v26  ;;  %718 = vmatpush1.bf16.msra.mxu1 %v649_v26  ;;  %v673_v3 = vpack.c.bf16 %v309_v0, %v307_v63  ;;  %v675_v4 = vpack.c.bf16 %v314_v2, %v312_v1  ;;  %v311_v5 = vld [vmem:[%s1190_s29 + $0x140] sm:$0xff]  ;;  %v313_v6 = vld [vmem:[%s1190_s29 + $0x150] sm:$0xff]  ;;  %v316_v7 = vld [vmem:[%s1190_s29 + $0x168] sm:$0xff] }
  0x6d   : > { %652 = vmatprep.subr.bf16.mxu0 %v651_v27  ;;  %703 = vmatprep.subr.bf16.mxu1 %v651_v27  ;;  %v318_v8 = vld [vmem:[%s1190_s29 + $0x178] sm:$0xff]  ;;  %v677_v9 = vpack.c.bf16 %v313_v6, %v311_v5  ;;  %v315_v11 = vld [vmem:[%s1190_s29 + $0x160] sm:$0xff]  ;;  %v317_v12 = vld [vmem:[%s1190_s29 + $0x170] sm:$0xff] }
  0x6e   : > { %v679_v10 = vpack.c.bf16 %v318_v8, %v316_v7  ;;  %v320_v13 = vld [vmem:[%s1190_s29 + $0x188] sm:$0xff]  ;;  %v322_v14 = vld [vmem:[%s1190_s29 + $0x198] sm:$0xff]  ;;  %v681_v15 = vpack.c.bf16 %v317_v12, %v315_v11  ;;  %v319_v17 = vld [vmem:[%s1190_s29 + $0x180] sm:$0xff] }
  0x6f   : > { %v683_v16 = vpack.c.bf16 %v322_v14, %v320_v13  ;;  %v321_v18 = vld [vmem:[%s1190_s29 + $0x190] sm:$0xff]  ;;  %v324_v19 = vld [vmem:[%s1190_s29 + $0x1a8] sm:$0xff]  ;;  %v326_v20 = vld [vmem:[%s1190_s29 + $0x1b8] sm:$0xff] }
  0x70   : > { %654 = vmatpush1.bf16.msra.mxu0 %v653_v32  ;;  %719 = vmatpush1.bf16.msra.mxu1 %v653_v32  ;;  %v685_v21 = vpack.c.bf16 %v321_v18, %v319_v17  ;;  %v687_v22 = vpack.c.bf16 %v326_v20, %v324_v19  ;;  %v323_v23 = vld [vmem:[%s1190_s29 + $0x1a0] sm:$0xff]  ;;  %v325_v24 = vld [vmem:[%s1190_s29 + $0x1b0] sm:$0xff]  ;;  %v328_v25 = vld [vmem:[%s1190_s29 + $0x1c8] sm:$0xff] }
  0x71   : > { %656 = vmatprep.subr.bf16.mxu0 %v655_v33  ;;  %704 = vmatprep.subr.bf16.mxu1 %v655_v33  ;;  %v330_v26 = vld [vmem:[%s1190_s29 + $0x1d8] sm:$0xff]  ;;  %v689_v27 = vpack.c.bf16 %v325_v24, %v323_v23  ;;  %v327_v29 = vld [vmem:[%s1190_s29 + $0x1c0] sm:$0xff]  ;;  %v329_v30 = vld [vmem:[%s1190_s29 + $0x1d0] sm:$0xff] }
  0x72   : > { %v691_v28 = vpack.c.bf16 %v330_v26, %v328_v25  ;;  %v332_v31 = vld [vmem:[%s1190_s29 + $0x1e8] sm:$0xff]  ;;  %v334_v32 = vld [vmem:[%s1190_s29 + $0x1f8] sm:$0xff]  ;;  %v693_v33 = vpack.c.bf16 %v329_v30, %v327_v29  ;;  %v331_v35 = vld [vmem:[%s1190_s29 + $0x1e0] sm:$0xff] }
  0x73   : > { %v695_v34 = vpack.c.bf16 %v334_v32, %v332_v31  ;;  %v333_v36 = vld [vmem:[%s1190_s29 + $0x1f0] sm:$0xff]  ;;  %v269_v41 = vld [vmem:[#allocation5 + $0x20] sm:$0xff] }
  0x74   : > { %658 = vmatpush1.bf16.msra.mxu0 %v657_v38  ;;  %720 = vmatpush1.bf16.msra.mxu1 %v657_v38  ;;  %v697_v37 = vpack.c.bf16 %v333_v36, %v331_v35  ;;  %v265_v38 = vld [vmem:[#allocation5] sm:$0xff]  ;;  %v267_v39 = vld [vmem:[#allocation5 + $0x10] sm:$0xff] }
  0x75   : > { %660 = vmatprep.subr.bf16.mxu0 %v659_v40  ;;  %705 = vmatprep.subr.bf16.mxu1 %v659_v40  ;;  %v270_v40 = vld [vmem:[#allocation5 + $0x28] sm:$0xff] }
  0x78   : > { %662 = vmatpush1.bf16.msra.mxu0 %v661_v47  ;;  %721 = vmatpush1.bf16.msra.mxu1 %v661_v47 }
  0x79   : > { %664 = vmatprep.subr.bf16.mxu0 %v663_v49  ;;  %706 = vmatprep.subr.bf16.mxu1 %v663_v49 }
  0x7c   : > { %666 = vmatpush1.bf16.msra.mxu0 %v665_v55  ;;  %722 = vmatpush1.bf16.msra.mxu1 %v665_v55 }
  0x7d   : > { %668 = vmatprep.subr.bf16.mxu0 %v667_v56  ;;  %707 = vmatprep.subr.bf16.mxu1 %v667_v56 }
  0x80   : > { %670 = vmatpush1.bf16.msra.mxu0 %v669_v61  ;;  %723 = vmatpush1.bf16.msra.mxu1 %v669_v61 }
  0x81   : > { %672 = vmatprep.subr.bf16.mxu0 %v671_v62  ;;  %708 = vmatprep.subr.bf16.mxu1 %v671_v62 }
  0x84   : > { %674 = vmatpush1.bf16.msra.mxu0 %v673_v3  ;;  %724 = vmatpush1.bf16.msra.mxu1 %v673_v3 }
  0x85   : > { %676 = vmatprep.subr.bf16.mxu0 %v675_v4  ;;  %709 = vmatprep.subr.bf16.mxu1 %v675_v4 }
  0x88   : > { %678 = vmatpush1.bf16.msra.mxu0 %v677_v9  ;;  %725 = vmatpush1.bf16.msra.mxu1 %v677_v9 }
  0x89   : > { %680 = vmatprep.subr.bf16.mxu0 %v679_v10  ;;  %710 = vmatprep.subr.bf16.mxu1 %v679_v10 }
  0x8c   : > { %682 = vmatpush1.bf16.msra.mxu0 %v681_v15  ;;  %726 = vmatpush1.bf16.msra.mxu1 %v681_v15 }
  0x8d   : > { %684 = vmatprep.subr.bf16.mxu0 %v683_v16  ;;  %711 = vmatprep.subr.bf16.mxu1 %v683_v16 }
  0x90   : > { %686 = vmatpush1.bf16.msra.mxu0 %v685_v21  ;;  %727 = vmatpush1.bf16.msra.mxu1 %v685_v21 }
  0x91   : > { %688 = vmatprep.subr.bf16.mxu0 %v687_v22  ;;  %712 = vmatprep.subr.bf16.mxu1 %v687_v22 }
  0x94   : > { %690 = vmatpush1.bf16.msra.mxu0 %v689_v27  ;;  %728 = vmatpush1.bf16.msra.mxu1 %v689_v27 }
  0x95   : > { %692 = vmatprep.subr.bf16.mxu0 %v691_v28  ;;  %713 = vmatprep.subr.bf16.mxu1 %v691_v28 }
  0x98   : > { %694 = vmatpush1.bf16.msra.mxu0 %v693_v33  ;;  %729 = vmatpush1.bf16.msra.mxu1 %v693_v33 }
  0x99   : > { %696 = vmatprep.subr.bf16.mxu0 %v695_v34  ;;  %714 = vmatprep.subr.bf16.mxu1 %v695_v34 }
  0x9c   : > { %698 = vmatpush1.bf16.msra.mxu0 %v697_v37  ;;  %730 = vmatpush1.bf16.msra.mxu1 %v697_v37 }
  0x9f   : > { %418 = vmatmul.mubr.f32.vlgmr.msra.gmra.mrb[0].mxu0 %v265_v38  ;;  %424 = vmatmul.mubr.f32.vlgmr.msra.gmra.mrb[0].mxu1 %v267_v39 }
  0xa0   : > { %429 = vmatprep.mubr.f32.mxu1 %v270_v40 }
  0xa3   : > { %430 = vmatmul.mubr.f32.gmra.mrb[2].mxu1 %v269_v41 }
  0xe6   : > { %v341_v42 = vpop.permute.xlu0 %340 }
  0xe9   : > { %v351_v52 = vpop.permute.xlu1 %350 }
  0xea   : > { %v346_v43 = vpop.permute.xlu0 %345 }
 0x172   : > { %v419_v44 = vpop.f32.mrb[0].mxu0  ;;  %v425_v45 = vpop.f32.mrb[0].mxu1 }
 0x173   : > { %v420_v46 = vadd.f32 %v419_v44, %v341_v42  ;;  %v426_v47 = vadd.f32 %v425_v45, %v346_v43  ;;  %v421_v48 = vpop.f32.mrb[1].mxu0  ;;  %v427_v49 = vpop.f32.mrb[1].mxu1 }
 0x174   : > { %v422_v50 = vadd.f32 %v421_v48, %v341_v42  ;;  %v428_v51 = vadd.f32 %v427_v49, %v346_v43 }
 0x175   : > { %436 = vst [vmem:[%s254_s9] sm:$0xff] %v420_v46  ;;  %438 = vst [vmem:[%s1276_s13] sm:$0xff] %v426_v47 }
 0x176   : > { %437 = vst [vmem:[%s254_s9 + $0x8] sm:$0xff] %v422_v50  ;;  %439 = vst [vmem:[%s1276_s13 + $0x8] sm:$0xff] %v428_v51  ;;  %v431_v53 = vpop.f32.mrb[2].mxu1 }
 0x177   : > { %v432_v54 = vadd.f32 %v431_v53, %v351_v52  ;;  %v433_v55 = vpop.f32.mrb[3].mxu1 }
 0x178   : > { %887 = shalt.err (!%p884_p5)
}
 0x179   : > { %s888_s8 = scalar_lea.hbm %s1282_s23, 256  ;;  %s892_s24 = scalar_lea.hbm %s1372_s3, 512 }
 0x17a   : > { %p889_p9 = scmp.ne.s32.totalorder %s1282_s23, %s888_s8  ;;  %p893_p3 = scmp.lt.u32.totalorder %s1282_s23, %s1372_s3 }
 0x17b   : > { %p894_p7 = scmp.lt.u32.totalorder %s892_s24, %s888_s8  ;;  %p896_p4 = scmp.lt.u32.totalorder %s888_s8, %s1282_s23 }
 0x17c   : > { %p890_p1 = pnand %p889_p9, %p1127_p10 }
 0x17d   : > { %p895_p13 = por %p894_p7, %p893_p3 }
 0x17e   : > { %p891_p2 = pneg %p890_p1 }
 0x17f   : > { %p897_p6 = por %p896_p4, %p895_p13 }
 0x181   : > { %p898_p8 = pnand %p897_p6, %p891_p2 }
 0x183   : > { %901 = shalt.err (!%p898_p8)
}
 0x184   : > { %737 = dma.vmem_to_hbm [thread:$0]  (%p1127_p10), %s1284_s11, 256, %s1282_s23, %s443_s27   ;;  %v434_v56 = vadd.f32 %v433_v55, %v351_v52  ;;  %440 = vst [vmem:[%s1276_s13 + $0x10] sm:$0xff] %v432_v54 }
 0x185   : > { %s1318_s28 = scalar_lea.hbm %s1373_s4, %s634_s25  ;;  %s448_s8 = scalar_lea.sflag [#allocation9], %s1186_s12 }
 0x186   : > { %441 = vst [vmem:[%s1276_s13 + $0x18] sm:$0xff] %v434_v56  ;;  %s902_s6 = scalar_lea.vmem %s1287_s7, 512  ;;  %s1000_s9 = smov [#allocation8]  }
 0x187   : > { %p903_p12 = scmp.ne.s32.totalorder %s1287_s7, %s902_s6  ;;  %s906_s24 = sshll.u32 %s1000_s9, 4  ;;  %s907_s24 = int_to_ptr.vmem [resolvable:$false] %s906_s24 }
 0x188   : > { %s908_s29 = scalar_lea.vmem %s907_s24, 1024  ;;  %p909_p5 = scmp.lt.s32.totalorder %s1287_s7, %s907_s24 }
 0x189   : > { %p904_p11 = pnand %p903_p12, %p1127_p10  ;;  %p910_p9 = scmp.lt.s32.totalorder %s908_s29, %s902_s6 }
 0x18b   : > { %p905_p0 = pneg %p904_p11  ;;  %p911_p1 = por %p910_p9, %p909_p5 }
 0x18d   : > { %p912_p2 = pnand %p911_p1, %p905_p0 }
 0x18f   : > { %915 = shalt.err (!%p912_p2)
}
 0x190   : > { %s916_s18 = scalar_lea.hbm %s1318_s28, 512  ;;  %s920_s23 = scalar_lea.hbm %s1373_s4, 1024 }
 0x191   : > { %p917_p3 = scmp.ne.s32.totalorder %s1318_s28, %s916_s18  ;;  %p921_p4 = scmp.lt.u32.totalorder %s1318_s28, %s1373_s4 }
 0x192   : > { %p922_p6 = scmp.lt.u32.totalorder %s920_s23, %s916_s18  ;;  %p924_p12 = scmp.lt.u32.totalorder %s916_s18, %s1318_s28 }
 0x193   : > { %p918_p7 = pnand %p917_p3, %p1127_p10 }
 0x194   : > { %p923_p8 = por %p922_p6, %p921_p4 }
 0x195   : > { %p919_p13 = pneg %p918_p7 }
 0x196   : > { %p925_p11 = por %p924_p12, %p923_p8 }
 0x198   : > { %p926_p0 = pnand %p925_p11, %p919_p13 }
 0x19a   : > { %929 = shalt.err (!%p926_p0)
}
 0x19b   : > { %s1001_s21 = smov 256   ;;  %s1002_s14 = smov 16  }
 0x19c   : > { %738 = dma.vmem_to_hbm [thread:$0]  (%p1127_p10), %s1287_s7, 512, %s1318_s28, %s448_s8, %s1001_s21, %s1001_s21, %s1002_s14  }
 0x19d PF: > { %s494_s22 = sand.u32 1, %s972_s15   ;;  %p1391_p5 = scmp.ne.s32.totalorder %s1381_s26, 0 }
 0x19e   : > { %p1392_p9 = scmp.ge.s32.totalorder %s992_s20, 2  ;;  %s495_s6 = scalar_lea.sflag [#allocation4], %s494_s22 }
 0x1a0   : > { %p750_p1 = pnand %p1392_p9, %p1391_p5 }
 0x1a2   : > { %963 = dma.done.wait (!%p750_p1), %s495_s6, 256  }
 0x1a3   : > { %965 = vsyncadd (!%p750_p1), %s495_s6, 4294967040  ;;  %s504_s9 = scalar_lea.sflag [#allocation9], %s494_s22 }
 0x1a4   : > { %967 = dma.done.wait (!%p750_p1), %s504_s9, 512  }
 0x1a5   : > { %969 = vsyncadd (!%p750_p1), %s504_s9, 4294966784  ;;  %s25_s20 = sadd.s32 1, %s992_s20   ;;  %s1393_s15 = smov %s976_s16 }
 0x1a6   : > { %p22_p2 = scmp.ge.s32.totalorder %s25_s20, 4   ;;  %s1394_s16 = smov %s980_s17 }
 0x1a7   : > { %s1395_s17 = smov %s1136_s10  ;;  %s1396_s18 = smov %s988_s19 }
 0x1a8   : > { %s1397_s19 = smov %s1399_s5  ;;  %24 = sbr.rel (!%p22_p2) target bundleno = 9 (0x9), region = 98 }
 0x1af   :  { %509 = vsyncpa [#allocation3], 1 }
 0x1b0   :  { %511 = vsyncpa [#allocation3 + $0x1], 1 }
 0x1b1   :  { %512 = vsyncpa [#allocation6], 1 }
 0x1b2   :  { %513 = vsyncpa [#allocation4], 1 }
 0x1b3   :  { %515 = vsyncpa [#allocation4 + $0x1], 1 }
 0x1b4   :  { %516 = vsyncpa [#allocation9], 1 }
 0x1b5   :  { %518 = vsyncpa [#allocation9 + $0x1], 1 }

</bundles_post_ra>
